<compile_context>
chip_gen: v6e
topology: v6e:2x2x1
jax: 0.10.0
libtpu: 0.0.40
codegen_flags: <defaults>
</compile_context>

<pallas_src>
import jax
import jax.numpy as jnp
from jax import lax
from jax.experimental import pallas as pl
from jax.experimental.pallas import tpu as pltpu

# Native MXU dtype on v5e/v6e/v7x.  Set to jnp.float32 to recover <1e-3
# agreement with the exact f32 reference (bf16 inputs give ~1e-2 max abs dev).
MXU_DTYPE = jnp.bfloat16
LANE = 128   # lane width
SUB = 8      # sublane granularity


# ----------------------------------------------------------------------------
# In-kernel math helpers (ops that lower cleanly on Pallas TPU)
# ----------------------------------------------------------------------------
def _erf(x):
    # Abramowitz & Stegun 7.1.26 (|err| < 1.5e-7): exp + polynomial only.
    a1, a2, a3, a4, a5 = (0.254829592, -0.284496736, 1.421413741,
                          -1.453152027, 1.061405429)
    p = 0.3275911
    s = jnp.where(x >= 0.0, 1.0, -1.0)
    ax = jnp.abs(x)
    t = 1.0 / (1.0 + p * ax)
    poly = ((((a5 * t + a4) * t + a3) * t + a2) * t + a1) * t
    return s * (1.0 - poly * jnp.exp(-ax * ax))


def _gelu(x):
    # exact (erf-based) GELU, matching torch.nn.GELU() default
    return 0.5 * x * (1.0 + _erf(x * 0.7071067811865476))


# ----------------------------------------------------------------------------
# Fused kernel: one batch element per grid step, all stages in VMEM
# ----------------------------------------------------------------------------
def _make_kernel(Tp, Hp, H_real, Op):
    nblk = Tp // SUB

    def kernel(x_ref, wenc_ref, benc_ref, kT_ref, d_ref,
               wglu_ref, bglu_ref, g_ref, beta_ref, wdec_ref, bdec_ref,
               o_ref, upad_ref, yacc_ref):
        # --- encoder Linear(d_input, d_model): bf16 MXU, f32 accumulation
        x = x_ref[0]                                             # (Tp, Dp)
        u = (jnp.dot(x, wenc_ref[...],
                     preferred_element_type=jnp.float32)
             + benc_ref[...])                                    # (Tp, Hp) f32

        # --- depthwise causal SSM conv: y[t,h] = sum_{s<=t} k[h,s] u[t-s,h]
        # Zero-padded staging buffer so every dynamic window read has an
        # 8-aligned sublane start; taps processed in blocks of 8 inside one
        # scf.for (trace size independent of T).
        upad_ref[pl.ds(0, Tp), :] = jnp.zeros((Tp, Hp), jnp.float32)
        upad_ref[pl.ds(Tp, Tp), :] = u
        yacc_ref[...] = u * d_ref[...]                           # D-skip term

        @pl.loop(0, nblk)
        def _(blk):
            start = pl.multiple_of(Tp - SUB * (blk + 1), SUB)
            win = upad_ref[pl.ds(start, Tp + SUB), :]            # aligned read
            kb = kT_ref[pl.ds(pl.multiple_of(blk * SUB, SUB), SUB), :]
            acc = yacc_ref[...]
            for r in range(SUB):                                 # 8-way unroll
                # tap s = blk*8 + r : win[8-r : 8-r+Tp] == u shifted down by s
                acc = acc + kb[r:r + 1, :] * win[SUB - r:SUB - r + Tp, :]
            yacc_ref[...] = acc

        yg = _gelu(yacc_ref[...])                                # exact GELU

        # --- fused GLU: one (Tp,Hp)@(Hp,2Hp) matmul, lane-aligned split
        z = (jnp.dot(yg.astype(MXU_DTYPE), wglu_ref[...],
                     preferred_element_type=jnp.float32)
             + bglu_ref[...])                                    # (Tp, 2Hp)
        z1 = z[:, :Hp]
        z2 = z[:, Hp:]
        sig = pl.reciprocal(1.0 + jnp.exp(-z2), approx=True)     # EUP rcp
        xres = z1 * sig + u                                      # GLU + resid

        # --- post-norm LayerNorm over the REAL d_model channels.
        # Padded lanes of xres are exactly 0, so full-lane sums are correct
        # when divided by H_real; one-pass variance; rsqrt on the EUP.
        inv_h = 1.0 / float(H_real)
        mu = jnp.sum(xres, axis=1, keepdims=True) * inv_h
        ex2 = jnp.sum(xres * xres, axis=1, keepdims=True) * inv_h
        var = ex2 - mu * mu
        xn = (xres - mu) * lax.rsqrt(var + 1e-5)
        xn = xn * g_ref[...] + beta_ref[...]     # padded gamma/beta are 0

        # --- decoder Linear(d_model, d_output) into a lane-dense 128 slab
        out = (jnp.dot(xn.astype(MXU_DTYPE), wdec_ref[...],
                       preferred_element_type=jnp.float32)
               + bdec_ref[...])                                  # (Tp, Op)
        o_ref[0] = out

    return kernel


# ----------------------------------------------------------------------------
# Parameter-only glue: materialize the S4D SSM kernel k(L)  (runs in XLA)
# ----------------------------------------------------------------------------
def ssm_kernel_k(p, L):
    dt = jnp.exp(p["log_dt"])                                    # (H,)
    C = p["C_re"] + 1j * p["C_im"]                               # (H, N/2)
    A = -jnp.exp(p["log_A_real"]) + 1j * p["A_imag"]             # (H, N/2)
    dtA = A * dt[:, None]
    K = dtA[:, :, None] * jnp.arange(L)                          # (H, N/2, L)
    Ck = C * (jnp.exp(dtA) - 1.0) / A
    k = 2.0 * jnp.einsum("hn,hnl->hl", Ck, jnp.exp(K)).real
    return k.astype(jnp.float32)                                 # (H, L)


# ----------------------------------------------------------------------------
# pallas_call wrapper (full forward)
# ----------------------------------------------------------------------------
def s4_model_forward(x, p):
    b, c, h, T = x.shape
    d_in = c * h
    H = p["W_enc"].shape[0]
    O = p["W_dec"].shape[0]                                      # == c*h

    Tp = SUB * pl.cdiv(T, SUB)          # token axis padded to sublane multiple
    Dp = LANE * pl.cdiv(d_in, LANE)     # lane-dense input features
    Hp = LANE * pl.cdiv(H, LANE)        # lane-dense d_model
    Op = LANE * pl.cdiv(O, LANE)        # lane-dense decoder output slab
    f32 = jnp.float32

    # module plumbing: (b,c,h,T) -> (b, c*h, T) -> (b, T, c*h); zero-pad.
    x_tok = jnp.transpose(x.reshape(b, d_in, T), (0, 2, 1))
    x_tok = jnp.pad(x_tok, ((0, 0), (0, Tp - T), (0, Dp - d_in)))
    x_tok = x_tok.astype(MXU_DTYPE)

    def padw(w, rows, cols):
        return jnp.zeros((rows, cols), f32).at[:w.shape[0], :w.shape[1]].set(w)

    def padv(v, n):
        return jnp.zeros((1, n), f32).at[0, :v.shape[0]].set(v)

    wenc = padw(p["W_enc"].T, Dp, Hp).astype(MXU_DTYPE)
    benc = padv(p["b_enc"], Hp)
    kT = padw(ssm_kernel_k(p, Tp).T, Tp, Hp)                     # (Tp, Hp) f32
    dsk = padv(p["D"], Hp)

    # fused GLU weight: linear half in lanes [0,Hp), gate half in [Hp,2Hp)
    wglu = jnp.zeros((Hp, 2 * Hp), f32)
    wglu = wglu.at[:H, :H].set(p["W_c"][:H].T)
    wglu = wglu.at[:H, Hp:Hp + H].set(p["W_c"][H:].T)
    wglu = wglu.astype(MXU_DTYPE)
    bglu = jnp.zeros((1, 2 * Hp), f32)
    bglu = bglu.at[0, :H].set(p["b_c"][:H]).at[0, Hp:Hp + H].set(p["b_c"][H:])

    gam = padv(p["gamma"], Hp)          # zero padding keeps padded lanes at 0
    bet = padv(p["beta"], Hp)
    wdec = padw(p["W_dec"].T, Hp, Op).astype(MXU_DTYPE)
    bdec = padv(p["b_dec"], Op)

    operands = (x_tok, wenc, benc, kT, dsk, wglu, bglu, gam, bet, wdec, bdec)

    def _rep(a):
        nd = a.ndim
        # TODO(synk): pipeline_mode=pl.Buffered(1) on these constant-index
        # weight operands (kT especially) once verified on the target jax.
        return pl.BlockSpec(a.shape, lambda i, _nd=nd: (0,) * _nd)

    in_specs = ([pl.BlockSpec((1, Tp, Dp), lambda i: (i, 0, 0))]
                + [_rep(a) for a in operands[1:]])

    # VMEM budget (double-buffered operands + output + scratch) and cost hint
    op_bytes = sum(2 * int(a.size) * a.dtype.itemsize for a in operands)
    out_bytes = 2 * Tp * Op * 4
    scratch_bytes = 3 * Tp * Hp * 4
    vmem_budget = min(2 * (op_bytes + out_bytes + scratch_bytes) + (8 << 20),
                      56 << 20)

    flops = (2 * b * Tp * (Dp * Hp + Tp * Hp + Hp * 2 * Hp + Hp * Op)
             + 30 * b * Tp * Hp)
    cost = pl.CostEstimate(
        flops=int(flops),
        transcendentals=int(3 * b * Tp * Hp),
        bytes_accessed=int(x_tok.size * x_tok.dtype.itemsize
                           + b * Tp * Op * 4
                           + sum(int(a.size) * a.dtype.itemsize
                                 for a in operands[1:])))

    kernel = _make_kernel(Tp, Hp, H, Op)

    out_pad = pl.pallas_call(
        kernel,
        out_shape=jax.ShapeDtypeStruct((b, Tp, Op), f32),
        grid=(b,),
        in_specs=in_specs,
        out_specs=pl.BlockSpec((1, Tp, Op), lambda i: (i, 0, 0)),
        scratch_shapes=[pltpu.VMEM((2 * Tp, Hp), f32),   # zero-padded u stage
                        pltpu.VMEM((Tp, Hp), f32)],      # conv accumulator
        compiler_params=pltpu.CompilerParams(
            dimension_semantics=("parallel",),
            vmem_limit_bytes=int(vmem_budget)),
        cost_estimate=cost,
    )(*operands)

    # TODO(synk): add a second parallel grid axis (token chunks via a chunked
    # state-space scan) so v7x's two TensorCores are used at small batch.
    out = jnp.transpose(out_pad[:, :T, :O], (0, 2, 1))           # (b, O, T)
    return out.reshape(b, c, h, T)


# ----------------------------------------------------------------------------
# Pure-JAX reference (follows the PyTorch forward op-for-op, FFT conv, f32)
# ----------------------------------------------------------------------------
def reference_forward(x, p):
    b, c, h, T = x.shape
    H = p["W_enc"].shape[0]
    x2 = jnp.transpose(x.reshape(b, c * h, T), (0, 2, 1))        # (b, T, c*h)
    xe = x2 @ p["W_enc"].T + p["b_enc"]                          # encoder
    u = jnp.transpose(xe, (0, 2, 1))                             # (b, H, T)
    k = ssm_kernel_k(p, T)
    y = jnp.fft.irfft(jnp.fft.rfft(u, n=2 * T) * jnp.fft.rfft(k, n=2 * T),
                      n=2 * T)[..., :T]
    y = y + u * p["D"][:, None]
    y = jax.nn.gelu(y, approximate=False)
    z = jnp.einsum("oh,bhl->bol", p["W_c"], y) + p["b_c"][:, None]
    zg = z[:, :H] * jax.nn.sigmoid(z[:, H:])
    xres = zg + u
    xt = jnp.transpose(xres, (0, 2, 1))                          # (b, T, H)
    mu = xt.mean(-1, keepdims=True)
    var = ((xt - mu) ** 2).mean(-1, keepdims=True)
    xn = (xt - mu) / jnp.sqrt(var + 1e-5) * p["gamma"] + p["beta"]
    out = xn @ p["W_dec"].T + p["b_dec"]                         # decoder
    out = jnp.transpose(out, (0, 2, 1))                          # (b, O, T)
    return out.reshape(b, c, h, T)


# ----------------------------------------------------------------------------
# Deterministic parameter initialization (shapes from the module's __init__)
# ----------------------------------------------------------------------------
def init_params(key, d_input, d_model, d_state, d_output):
    H, N2 = d_model, d_state // 2
    ks = jax.random.split(key, 10)
    dt_min, dt_max = 0.001, 0.1
    lim_e = 1.0 / jnp.sqrt(float(d_input))
    lim_m = 1.0 / jnp.sqrt(float(d_model))
    return dict(
        W_enc=jax.random.uniform(ks[0], (H, d_input), jnp.float32, -lim_e, lim_e),
        b_enc=jax.random.uniform(ks[1], (H,), jnp.float32, -lim_e, lim_e),
        log_dt=(jax.random.uniform(ks[2], (H,), jnp.float32)
                * (jnp.log(dt_max) - jnp.log(dt_min)) + jnp.log(dt_min)),
        C_re=jax.random.normal(ks[3], (H, N2), jnp.float32),
        C_im=jax.random.normal(ks[4], (H, N2), jnp.float32),
        log_A_real=jnp.log(0.5 * jnp.ones((H, N2), jnp.float32)),
        A_imag=jnp.pi * jnp.broadcast_to(jnp.arange(N2, dtype=jnp.float32), (H, N2)),
        D=jax.random.normal(ks[5], (H,), jnp.float32),
        W_c=jax.random.uniform(ks[6], (2 * H, H), jnp.float32, -lim_m, lim_m),
        b_c=jax.random.uniform(ks[7], (2 * H,), jnp.float32, -lim_m, lim_m),
        gamma=jnp.ones((H,), jnp.float32),
        beta=jnp.zeros((H,), jnp.float32),
        W_dec=jax.random.uniform(ks[8], (d_output, H), jnp.float32, -lim_m, lim_m),
        b_dec=jax.random.uniform(ks[9], (d_output,), jnp.float32, -lim_m, lim_m),
    )


if __name__ == "__main__":
    b, c, h, T = 2, 4, 16, 16
    d_input = d_output = c * h        # required by the module's final reshape
    d_model, d_state = 32, 64

    key = jax.random.PRNGKey(0)
    kx, kp = jax.random.split(key)
    x = jax.random.normal(kx, (b, c, h, T), dtype=jnp.float32)
    params = init_params(kp, d_input, d_model, d_state, d_output)

    out = jax.block_until_ready(s4_model_forward(x, params))
    ref = jax.block_until_ready(reference_forward(x, params))

    assert out.shape == (b, c, h, T), out.shape
    max_err = float(jnp.max(jnp.abs(out - ref)))
    # bf16 MXU operands deviate from the exact f32 reference by O(1e-2) abs;
    # setting MXU_DTYPE = jnp.float32 restores <1e-3 agreement.
    tol = 1e-3 if MXU_DTYPE == jnp.float32 else 5e-2
    assert max_err < tol, f"mismatch vs reference: max abs err = {max_err}"
    print("KERNEL_OK")
</pallas_src>

<mosaic_0001>
module attributes {stable_mosaic.version = 11 : i64} {
  func.func @kernel(%arg0: i32, %arg1: memref<1x16x128xbf16, #tpu.memory_space<vmem>>, %arg2: memref<128x128xbf16, #tpu.memory_space<vmem>>, %arg3: memref<1x128xf32, #tpu.memory_space<vmem>>, %arg4: memref<16x128xf32, #tpu.memory_space<vmem>>, %arg5: memref<1x128xf32, #tpu.memory_space<vmem>>, %arg6: memref<128x256xbf16, #tpu.memory_space<vmem>>, %arg7: memref<1x256xf32, #tpu.memory_space<vmem>>, %arg8: memref<1x128xf32, #tpu.memory_space<vmem>>, %arg9: memref<1x128xf32, #tpu.memory_space<vmem>>, %arg10: memref<128x128xbf16, #tpu.memory_space<vmem>>, %arg11: memref<1x128xf32, #tpu.memory_space<vmem>>, %arg12: memref<1x16x128xf32, #tpu.memory_space<vmem>>, %arg13: memref<32x128xf32, #tpu.memory_space<vmem>>, %arg14: memref<16x128xf32, #tpu.memory_space<vmem>>) attributes {dimension_semantics = [#tpu.dimension_semantics<parallel>], iteration_bounds = array<i64: 2>, scalar_prefetch = 0 : i64, scratch_operands = 2 : i64, tpu.core_type = #tpu.core_type<tc>, window_params = [{transform_indices = @transform_0, window_bounds = array<i64: 1, 16, 128>}, {pipeline_mode = #tpu.pipeline_mode<synchronous>, transform_indices = @transform_1, window_bounds = array<i64: 128, 128>}, {pipeline_mode = #tpu.pipeline_mode<synchronous>, transform_indices = @transform_2, window_bounds = array<i64: 1, 128>}, {pipeline_mode = #tpu.pipeline_mode<synchronous>, transform_indices = @transform_3, window_bounds = array<i64: 16, 128>}, {pipeline_mode = #tpu.pipeline_mode<synchronous>, transform_indices = @transform_4, window_bounds = array<i64: 1, 128>}, {pipeline_mode = #tpu.pipeline_mode<synchronous>, transform_indices = @transform_5, window_bounds = array<i64: 128, 256>}, {pipeline_mode = #tpu.pipeline_mode<synchronous>, transform_indices = @transform_6, window_bounds = array<i64: 1, 256>}, {pipeline_mode = #tpu.pipeline_mode<synchronous>, transform_indices = @transform_7, window_bounds = array<i64: 1, 128>}, {pipeline_mode = #tpu.pipeline_mode<synchronous>, transform_indices = @transform_8, window_bounds = array<i64: 1, 128>}, {pipeline_mode = #tpu.pipeline_mode<synchronous>, transform_indices = @transform_9, window_bounds = array<i64: 128, 128>}, {pipeline_mode = #tpu.pipeline_mode<synchronous>, transform_indices = @transform_10, window_bounds = array<i64: 1, 128>}, {transform_indices = @transform_11, window_bounds = array<i64: 1, 16, 128>}]} {
    %c0 = arith.constant 0 : index
    %c0_0 = arith.constant 0 : index
    %c0_1 = arith.constant 0 : index
    %0 = vector.load %arg1[%c0, %c0_0, %c0_1] : memref<1x16x128xbf16, #tpu.memory_space<vmem>>, vector<1x16x128xbf16>
    %1 = vector.shape_cast %0 : vector<1x16x128xbf16> to vector<16x128xbf16>
    %c0_2 = arith.constant 0 : index
    %c0_3 = arith.constant 0 : index
    %2 = vector.load %arg2[%c0_2, %c0_3] : memref<128x128xbf16, #tpu.memory_space<vmem>>, vector<128x128xbf16>
    %cst = arith.constant dense<0.000000e+00> : vector<16x128xf32>
    %3 = tpu.matmul %1, %2, %cst {dimension_numbers = #tpu.dot_dimension_numbers<[1], [0], [0], [1], [0, 0, 1, 1], [], []>} : vector<16x128xbf16>, vector<128x128xbf16>, vector<16x128xf32> -> vector<16x128xf32>
    %c0_4 = arith.constant 0 : index
    %c0_5 = arith.constant 0 : index
    %4 = vector.load %arg3[%c0_4, %c0_5] : memref<1x128xf32, #tpu.memory_space<vmem>>, vector<1x128xf32>
    %5 = vector.broadcast %4 : vector<1x128xf32> to vector<16x128xf32>
    %6 = arith.addf %3, %5 : vector<16x128xf32>
    %cst_6 = arith.constant 0.000000e+00 : f32
    %7 = vector.broadcast %cst_6 : f32 to vector<16x128xf32>
    %c0_7 = arith.constant 0 : index
    %c0_8 = arith.constant 0 : index
    %8 = vector.load %arg13[%c0_7, %c0_8] : memref<32x128xf32, #tpu.memory_space<vmem>>, vector<16x128xf32>
    tpu.vector_store %arg13[%c0_7, %c0_8], %7 {strides = array<i32>} : memref<32x128xf32, #tpu.memory_space<vmem>>, vector<16x128xf32>,
    %c16 = arith.constant 16 : index
    %c0_9 = arith.constant 0 : index
    %9 = vector.load %arg13[%c16, %c0_9] : memref<32x128xf32, #tpu.memory_space<vmem>>, vector<16x128xf32>
    tpu.vector_store %arg13[%c16, %c0_9], %6 {strides = array<i32>} : memref<32x128xf32, #tpu.memory_space<vmem>>, vector<16x128xf32>,
    %c0_10 = arith.constant 0 : index
    %c0_11 = arith.constant 0 : index
    %10 = vector.load %arg5[%c0_10, %c0_11] : memref<1x128xf32, #tpu.memory_space<vmem>>, vector<1x128xf32>
    %11 = vector.broadcast %10 : vector<1x128xf32> to vector<16x128xf32>
    %12 = arith.mulf %6, %11 : vector<16x128xf32>
    %c0_12 = arith.constant 0 : index
    %c0_13 = arith.constant 0 : index
    %13 = vector.load %arg14[%c0_12, %c0_13] : memref<16x128xf32, #tpu.memory_space<vmem>>, vector<16x128xf32>
    tpu.vector_store %arg14[%c0_12, %c0_13], %12 {strides = array<i32>} : memref<16x128xf32, #tpu.memory_space<vmem>>, vector<16x128xf32>,
    %c0_i32 = arith.constant 0 : i32
    %c2_i32 = arith.constant 2 : i32
    %14 = arith.addi %c0_i32, %c2_i32 : i32
    %c1_i32 = arith.constant 1 : i32
    scf.for %arg15 = %c0_i32 to %14 step %c1_i32  : i32 {
      %c1_i32_57 = arith.constant 1 : i32
      %106 = arith.muli %arg15, %c1_i32_57 : i32
      %c0_i32_58 = arith.constant 0 : i32
      %107 = arith.addi %c0_i32_58, %106 : i32
      %c1_i32_59 = arith.constant 1 : i32
      %108 = arith.addi %107, %c1_i32_59 : i32
      %c8_i32 = arith.constant 8 : i32
      %109 = arith.muli %c8_i32, %108 : i32
      %c16_i32 = arith.constant 16 : i32
      %110 = arith.subi %c16_i32, %109 : i32
      %111 = tpu.assume_multiple %110, 8 : i32
      %112 = arith.index_cast %111 : i32 to index
      %c0_60 = arith.constant 0 : index
      %113 = vector.load %arg13[%112, %c0_60] : memref<32x128xf32, #tpu.memory_space<vmem>>, vector<24x128xf32>
      %c8_i32_61 = arith.constant 8 : i32
      %114 = arith.muli %107, %c8_i32_61 : i32
      %115 = tpu.assume_multiple %114, 8 : i32
      %116 = arith.index_cast %115 : i32 to index
      %c0_62 = arith.constant 0 : index
      %117 = vector.load %arg4[%116, %c0_62] : memref<16x128xf32, #tpu.memory_space<vmem>>, vector<8x128xf32>
      %c0_63 = arith.constant 0 : index
      %c0_64 = arith.constant 0 : index
      %118 = vector.load %arg14[%c0_63, %c0_64] : memref<16x128xf32, #tpu.memory_space<vmem>>, vector<16x128xf32>
      %119 = vector.extract_strided_slice %117 {offsets = [0, 0], sizes = [1, 128], strides = [1, 1]} : vector<8x128xf32> to vector<1x128xf32>
      %120 = vector.extract_strided_slice %113 {offsets = [8, 0], sizes = [16, 128], strides = [1, 1]} : vector<24x128xf32> to vector<16x128xf32>
      %121 = vector.broadcast %119 : vector<1x128xf32> to vector<16x128xf32>
      %122 = arith.mulf %121, %120 : vector<16x128xf32>
      %123 = arith.addf %118, %122 : vector<16x128xf32>
      %124 = vector.extract_strided_slice %117 {offsets = [1, 0], sizes = [1, 128], strides = [1, 1]} : vector<8x128xf32> to vector<1x128xf32>
      %125 = vector.extract_strided_slice %113 {offsets = [7, 0], sizes = [16, 128], strides = [1, 1]} : vector<24x128xf32> to vector<16x128xf32>
      %126 = vector.broadcast %124 : vector<1x128xf32> to vector<16x128xf32>
      %127 = arith.mulf %126, %125 : vector<16x128xf32>
      %128 = arith.addf %123, %127 : vector<16x128xf32>
      %129 = vector.extract_strided_slice %117 {offsets = [2, 0], sizes = [1, 128], strides = [1, 1]} : vector<8x128xf32> to vector<1x128xf32>
      %130 = vector.extract_strided_slice %113 {offsets = [6, 0], sizes = [16, 128], strides = [1, 1]} : vector<24x128xf32> to vector<16x128xf32>
      %131 = vector.broadcast %129 : vector<1x128xf32> to vector<16x128xf32>
      %132 = arith.mulf %131, %130 : vector<16x128xf32>
      %133 = arith.addf %128, %132 : vector<16x128xf32>
      %134 = vector.extract_strided_slice %117 {offsets = [3, 0], sizes = [1, 128], strides = [1, 1]} : vector<8x128xf32> to vector<1x128xf32>
      %135 = vector.extract_strided_slice %113 {offsets = [5, 0], sizes = [16, 128], strides = [1, 1]} : vector<24x128xf32> to vector<16x128xf32>
      %136 = vector.broadcast %134 : vector<1x128xf32> to vector<16x128xf32>
      %137 = arith.mulf %136, %135 : vector<16x128xf32>
      %138 = arith.addf %133, %137 : vector<16x128xf32>
      %139 = vector.extract_strided_slice %117 {offsets = [4, 0], sizes = [1, 128], strides = [1, 1]} : vector<8x128xf32> to vector<1x128xf32>
      %140 = vector.extract_strided_slice %113 {offsets = [4, 0], sizes = [16, 128], strides = [1, 1]} : vector<24x128xf32> to vector<16x128xf32>
      %141 = vector.broadcast %139 : vector<1x128xf32> to vector<16x128xf32>
      %142 = arith.mulf %141, %140 : vector<16x128xf32>
      %143 = arith.addf %138, %142 : vector<16x128xf32>
      %144 = vector.extract_strided_slice %117 {offsets = [5, 0], sizes = [1, 128], strides = [1, 1]} : vector<8x128xf32> to vector<1x128xf32>
      %145 = vector.extract_strided_slice %113 {offsets = [3, 0], sizes = [16, 128], strides = [1, 1]} : vector<24x128xf32> to vector<16x128xf32>
      %146 = vector.broadcast %144 : vector<1x128xf32> to vector<16x128xf32>
      %147 = arith.mulf %146, %145 : vector<16x128xf32>
      %148 = arith.addf %143, %147 : vector<16x128xf32>
      %149 = vector.extract_strided_slice %117 {offsets = [6, 0], sizes = [1, 128], strides = [1, 1]} : vector<8x128xf32> to vector<1x128xf32>
      %150 = vector.extract_strided_slice %113 {offsets = [2, 0], sizes = [16, 128], strides = [1, 1]} : vector<24x128xf32> to vector<16x128xf32>
      %151 = vector.broadcast %149 : vector<1x128xf32> to vector<16x128xf32>
      %152 = arith.mulf %151, %150 : vector<16x128xf32>
      %153 = arith.addf %148, %152 : vector<16x128xf32>
      %154 = vector.extract_strided_slice %117 {offsets = [7, 0], sizes = [1, 128], strides = [1, 1]} : vector<8x128xf32> to vector<1x128xf32>
      %155 = vector.extract_strided_slice %113 {offsets = [1, 0], sizes = [16, 128], strides = [1, 1]} : vector<24x128xf32> to vector<16x128xf32>
      %156 = vector.broadcast %154 : vector<1x128xf32> to vector<16x128xf32>
      %157 = arith.mulf %156, %155 : vector<16x128xf32>
      %158 = arith.addf %153, %157 : vector<16x128xf32>
      %c0_65 = arith.constant 0 : index
      %c0_66 = arith.constant 0 : index
      %159 = vector.load %arg14[%c0_65, %c0_66] : memref<16x128xf32, #tpu.memory_space<vmem>>, vector<16x128xf32>
      tpu.vector_store %arg14[%c0_65, %c0_66], %158 {strides = array<i32>} : memref<16x128xf32, #tpu.memory_space<vmem>>, vector<16x128xf32>,
    }
    %c2_i32_14 = arith.constant 2 : i32
    %c0_15 = arith.constant 0 : index
    %c0_16 = arith.constant 0 : index
    %15 = vector.load %arg14[%c0_15, %c0_16] : memref<16x128xf32, #tpu.memory_space<vmem>>, vector<16x128xf32>
    %cst_17 = arith.constant 5.000000e-01 : f32
    %16 = vector.broadcast %cst_17 : f32 to vector<16x128xf32>
    %17 = arith.mulf %16, %15 : vector<16x128xf32>
    %cst_18 = arith.constant 0.707106769 : f32
    %18 = vector.broadcast %cst_18 : f32 to vector<16x128xf32>
    %19 = arith.mulf %15, %18 : vector<16x128xf32>
    %cst_19 = arith.constant 0.000000e+00 : f32
    %20 = vector.broadcast %cst_19 : f32 to vector<16x128xf32>
    %21 = arith.cmpf oge, %19, %20 : vector<16x128xf32>
    %cst_20 = arith.constant 1.000000e+00 : f32
    %cst_21 = arith.constant -1.000000e+00 : f32
    %22 = vector.broadcast %cst_20 : f32 to vector<16x128xf32>
    %23 = vector.broadcast %cst_21 : f32 to vector<16x128xf32>
    %24 = arith.select %21, %22, %23 : vector<16x128xi1>, vector<16x128xf32>
    %25 = math.absf %19 : vector<16x128xf32>
    %cst_22 = arith.constant 0.327591091 : f32
    %26 = vector.broadcast %cst_22 : f32 to vector<16x128xf32>
    %27 = arith.mulf %26, %25 : vector<16x128xf32>
    %cst_23 = arith.constant 1.000000e+00 : f32
    %28 = vector.broadcast %cst_23 : f32 to vector<16x128xf32>
    %29 = arith.addf %28, %27 : vector<16x128xf32>
    %cst_24 = arith.constant 1.000000e+00 : f32
    %30 = vector.broadcast %cst_24 : f32 to vector<16x128xf32>
    %31 = arith.divf %30, %29 : vector<16x128xf32>
    %cst_25 = arith.constant 1.06140542 : f32
    %32 = vector.broadcast %cst_25 : f32 to vector<16x128xf32>
    %33 = arith.mulf %32, %31 : vector<16x128xf32>
    %cst_26 = arith.constant -1.45315206 : f32
    %34 = vector.broadcast %cst_26 : f32 to vector<16x128xf32>
    %35 = arith.addf %33, %34 : vector<16x128xf32>
    %36 = arith.mulf %35, %31 : vector<16x128xf32>
    %cst_27 = arith.constant 1.42141378 : f32
    %37 = vector.broadcast %cst_27 : f32 to vector<16x128xf32>
    %38 = arith.addf %36, %37 : vector<16x128xf32>
    %39 = arith.mulf %38, %31 : vector<16x128xf32>
    %cst_28 = arith.constant -0.284496725 : f32
    %40 = vector.broadcast %cst_28 : f32 to vector<16x128xf32>
    %41 = arith.addf %39, %40 : vector<16x128xf32>
    %42 = arith.mulf %41, %31 : vector<16x128xf32>
    %cst_29 = arith.constant 0.254829586 : f32
    %43 = vector.broadcast %cst_29 : f32 to vector<16x128xf32>
    %44 = arith.addf %42, %43 : vector<16x128xf32>
    %45 = arith.mulf %44, %31 : vector<16x128xf32>
    %cst_30 = arith.constant 0.000000e+00 : f32
    %46 = vector.broadcast %cst_30 : f32 to vector<16x128xf32>
    %47 = arith.subf %46, %25 : vector<16x128xf32>
    %48 = arith.mulf %47, %25 : vector<16x128xf32>
    %49 = math.exp %48 : vector<16x128xf32>
    %50 = arith.mulf %45, %49 : vector<16x128xf32>
    %cst_31 = arith.constant 1.000000e+00 : f32
    %51 = vector.broadcast %cst_31 : f32 to vector<16x128xf32>
    %52 = arith.subf %51, %50 : vector<16x128xf32>
    %53 = arith.mulf %24, %52 : vector<16x128xf32>
    %cst_32 = arith.constant 1.000000e+00 : f32
    %54 = vector.broadcast %cst_32 : f32 to vector<16x128xf32>
    %55 = arith.addf %54, %53 : vector<16x128xf32>
    %56 = arith.mulf %17, %55 : vector<16x128xf32>
    %57 = arith.truncf %56 : vector<16x128xf32> to vector<16x128xbf16>
    %c0_33 = arith.constant 0 : index
    %c0_34 = arith.constant 0 : index
    %58 = vector.load %arg6[%c0_33, %c0_34] : memref<128x256xbf16, #tpu.memory_space<vmem>>, vector<128x256xbf16>
    %cst_35 = arith.constant dense<0.000000e+00> : vector<16x256xf32>
    %59 = tpu.matmul %57, %58, %cst_35 {dimension_numbers = #tpu.dot_dimension_numbers<[1], [0], [0], [1], [0, 0, 1, 1], [], []>} : vector<16x128xbf16>, vector<128x256xbf16>, vector<16x256xf32> -> vector<16x256xf32>
    %c0_36 = arith.constant 0 : index
    %c0_37 = arith.constant 0 : index
    %60 = vector.load %arg7[%c0_36, %c0_37] : memref<1x256xf32, #tpu.memory_space<vmem>>, vector<1x256xf32>
    %61 = vector.broadcast %60 : vector<1x256xf32> to vector<16x256xf32>
    %62 = arith.addf %59, %61 : vector<16x256xf32>
    %63 = vector.extract_strided_slice %62 {offsets = [0, 0], sizes = [16, 128], strides = [1, 1]} : vector<16x256xf32> to vector<16x128xf32>
    %64 = vector.extract_strided_slice %62 {offsets = [0, 128], sizes = [16, 128], strides = [1, 1]} : vector<16x256xf32> to vector<16x128xf32>
    %cst_38 = arith.constant 0.000000e+00 : f32
    %65 = vector.broadcast %cst_38 : f32 to vector<16x128xf32>
    %66 = arith.subf %65, %64 : vector<16x128xf32>
    %67 = math.exp %66 : vector<16x128xf32>
    %cst_39 = arith.constant 1.000000e+00 : f32
    %68 = vector.broadcast %cst_39 : f32 to vector<16x128xf32>
    %69 = arith.addf %68, %67 : vector<16x128xf32>
    %70 = tpu.reciprocal %69 {approx = true} : vector<16x128xf32> -> vector<16x128xf32>
    %71 = arith.mulf %63, %70 : vector<16x128xf32>
    %72 = arith.addf %71, %6 : vector<16x128xf32>
    %cst_40 = arith.constant dense<0.000000e+00> : vector<16xf32>
    %73 = vector.multi_reduction <add>, %72, %cst_40 [1] : vector<16x128xf32> to vector<16xf32>
    %74 = vector.shape_cast %73 : vector<16xf32> to vector<16x1xf32>
    %cst_41 = arith.constant 3.125000e-02 : f32
    %75 = vector.broadcast %cst_41 : f32 to vector<16x1xf32>
    %76 = arith.mulf %74, %75 : vector<16x1xf32>
    %77 = arith.mulf %72, %72 : vector<16x128xf32>
    %cst_42 = arith.constant dense<0.000000e+00> : vector<16xf32>
    %78 = vector.multi_reduction <add>, %77, %cst_42 [1] : vector<16x128xf32> to vector<16xf32>
    %79 = vector.shape_cast %78 : vector<16xf32> to vector<16x1xf32>
    %cst_43 = arith.constant 3.125000e-02 : f32
    %80 = vector.broadcast %cst_43 : f32 to vector<16x1xf32>
    %81 = arith.mulf %79, %80 : vector<16x1xf32>
    %82 = arith.mulf %76, %76 : vector<16x1xf32>
    %83 = arith.subf %81, %82 : vector<16x1xf32>
    %84 = vector.broadcast %76 : vector<16x1xf32> to vector<16x128xf32>
    %85 = arith.subf %72, %84 : vector<16x128xf32>
    %cst_44 = arith.constant 9.99999974E-6 : f32
    %86 = vector.broadcast %cst_44 : f32 to vector<16x1xf32>
    %87 = arith.addf %83, %86 : vector<16x1xf32>
    %88 = math.rsqrt %87 : vector<16x1xf32>
    %89 = vector.broadcast %88 : vector<16x1xf32> to vector<16x128xf32>
    %90 = arith.mulf %85, %89 : vector<16x128xf32>
    %c0_45 = arith.constant 0 : index
    %c0_46 = arith.constant 0 : index
    %91 = vector.load %arg8[%c0_45, %c0_46] : memref<1x128xf32, #tpu.memory_space<vmem>>, vector<1x128xf32>
    %92 = vector.broadcast %91 : vector<1x128xf32> to vector<16x128xf32>
    %93 = arith.mulf %90, %92 : vector<16x128xf32>
    %c0_47 = arith.constant 0 : index
    %c0_48 = arith.constant 0 : index
    %94 = vector.load %arg9[%c0_47, %c0_48] : memref<1x128xf32, #tpu.memory_space<vmem>>, vector<1x128xf32>
    %95 = vector.broadcast %94 : vector<1x128xf32> to vector<16x128xf32>
    %96 = arith.addf %93, %95 : vector<16x128xf32>
    %97 = arith.truncf %96 : vector<16x128xf32> to vector<16x128xbf16>
    %c0_49 = arith.constant 0 : index
    %c0_50 = arith.constant 0 : index
    %98 = vector.load %arg10[%c0_49, %c0_50] : memref<128x128xbf16, #tpu.memory_space<vmem>>, vector<128x128xbf16>
    %cst_51 = arith.constant dense<0.000000e+00> : vector<16x128xf32>
    %99 = tpu.matmul %97, %98, %cst_51 {dimension_numbers = #tpu.dot_dimension_numbers<[1], [0], [0], [1], [0, 0, 1, 1], [], []>} : vector<16x128xbf16>, vector<128x128xbf16>, vector<16x128xf32> -> vector<16x128xf32>
    %c0_52 = arith.constant 0 : index
    %c0_53 = arith.constant 0 : index
    %100 = vector.load %arg11[%c0_52, %c0_53] : memref<1x128xf32, #tpu.memory_space<vmem>>, vector<1x128xf32>
    %101 = vector.broadcast %100 : vector<1x128xf32> to vector<16x128xf32>
    %102 = arith.addf %99, %101 : vector<16x128xf32>
    %c0_54 = arith.constant 0 : index
    %c0_55 = arith.constant 0 : index
    %c0_56 = arith.constant 0 : index
    %103 = vector.load %arg12[%c0_54, %c0_55, %c0_56] : memref<1x16x128xf32, #tpu.memory_space<vmem>>, vector<1x16x128xf32>
    %104 = vector.shape_cast %103 : vector<1x16x128xf32> to vector<16x128xf32>
    %105 = vector.shape_cast %102 : vector<16x128xf32> to vector<1x16x128xf32>
    tpu.vector_store %arg12[%c0_54, %c0_55, %c0_56], %105 {strides = array<i32>} : memref<1x16x128xf32, #tpu.memory_space<vmem>>, vector<1x16x128xf32>,
    return
  }
  func.func @transform_0(%arg0: i32) -> (i32, i32, i32) {
    %c0_i32 = arith.constant 0 : i32
    %c0_i32_0 = arith.constant 0 : i32
    %c0_i32_1 = arith.constant 0 : i32
    return %arg0, %c0_i32, %c0_i32_0 : i32, i32, i32
  }
  func.func @transform_1(%arg0: i32) -> (i32, i32) {
    %c0_i32 = arith.constant 0 : i32
    %c0_i32_0 = arith.constant 0 : i32
    %c0_i32_1 = arith.constant 0 : i32
    return %c0_i32, %c0_i32_0 : i32, i32
  }
  func.func @transform_2(%arg0: i32) -> (i32, i32) {
    %c0_i32 = arith.constant 0 : i32
    %c0_i32_0 = arith.constant 0 : i32
    %c0_i32_1 = arith.constant 0 : i32
    return %c0_i32, %c0_i32_0 : i32, i32
  }
  func.func @transform_3(%arg0: i32) -> (i32, i32) {
    %c0_i32 = arith.constant 0 : i32
    %c0_i32_0 = arith.constant 0 : i32
    %c0_i32_1 = arith.constant 0 : i32
    return %c0_i32, %c0_i32_0 : i32, i32
  }
  func.func @transform_4(%arg0: i32) -> (i32, i32) {
    %c0_i32 = arith.constant 0 : i32
    %c0_i32_0 = arith.constant 0 : i32
    %c0_i32_1 = arith.constant 0 : i32
    return %c0_i32, %c0_i32_0 : i32, i32
  }
  func.func @transform_5(%arg0: i32) -> (i32, i32) {
    %c0_i32 = arith.constant 0 : i32
    %c0_i32_0 = arith.constant 0 : i32
    %c0_i32_1 = arith.constant 0 : i32
    return %c0_i32, %c0_i32_0 : i32, i32
  }
  func.func @transform_6(%arg0: i32) -> (i32, i32) {
    %c0_i32 = arith.constant 0 : i32
    %c0_i32_0 = arith.constant 0 : i32
    %c0_i32_1 = arith.constant 0 : i32
    return %c0_i32, %c0_i32_0 : i32, i32
  }
  func.func @transform_7(%arg0: i32) -> (i32, i32) {
    %c0_i32 = arith.constant 0 : i32
    %c0_i32_0 = arith.constant 0 : i32
    %c0_i32_1 = arith.constant 0 : i32
    return %c0_i32, %c0_i32_0 : i32, i32
  }
  func.func @transform_8(%arg0: i32) -> (i32, i32) {
    %c0_i32 = arith.constant 0 : i32
    %c0_i32_0 = arith.constant 0 : i32
    %c0_i32_1 = arith.constant 0 : i32
    return %c0_i32, %c0_i32_0 : i32, i32
  }
  func.func @transform_9(%arg0: i32) -> (i32, i32) {
    %c0_i32 = arith.constant 0 : i32
    %c0_i32_0 = arith.constant 0 : i32
    %c0_i32_1 = arith.constant 0 : i32
    return %c0_i32, %c0_i32_0 : i32, i32
  }
  func.func @transform_10(%arg0: i32) -> (i32, i32) {
    %c0_i32 = arith.constant 0 : i32
    %c0_i32_0 = arith.constant 0 : i32
    %c0_i32_1 = arith.constant 0 : i32
    return %c0_i32, %c0_i32_0 : i32, i32
  }
  func.func @transform_11(%arg0: i32) -> (i32, i32, i32) {
    %c0_i32 = arith.constant 0 : i32
    %c0_i32_0 = arith.constant 0 : i32
    %c0_i32_1 = arith.constant 0 : i32
    return %arg0, %c0_i32, %c0_i32_0 : i32, i32, i32
  }
}

</mosaic_0001>

<bundles_post_ra>
// kernel: tpu_custom_call.1
= control target key start
LH: loop header
LB: loop body
LE: loop exit
PB: predicated region body
PF: predicated region fallthrough
CT: control target
= control target key end

     0   :  { %s2202_s0 = inlined_call_operand.hbm [shape: bf16[2,16,128], index: 0, kind: input, shape index: {}]   ;;  %s2203_s1 = inlined_call_operand.hbm [shape: bf16[128,128], index: 1, kind: input, shape index: {}]   ;;  %s2204_s2 = inlined_call_operand.vmem [shape: f32[1,128], index: 2, kind: input, shape index: {}]   ;;  %s2205_s3 = inlined_call_operand.hbm [shape: f32[16,128], index: 3, kind: input, shape index: {}]   ;;  %s2206_s4 = inlined_call_operand.vmem [shape: f32[1,128], index: 4, kind: input, shape index: {}]   ;;  %s2207_s5 = inlined_call_operand.hbm [shape: bf16[128,256], index: 5, kind: input, shape index: {}]   ;;  %s2208_s6 = inlined_call_operand.vmem [shape: f32[1,256], index: 6, kind: input, shape index: {}]   ;;  %s2209_s7 = inlined_call_operand.vmem [shape: f32[1,128], index: 7, kind: input, shape index: {}]   ;;  %s2210_s8 = inlined_call_operand.vmem [shape: f32[1,128], index: 8, kind: input, shape index: {}]   ;;  %s2211_s9 = inlined_call_operand.hbm [shape: bf16[128,128], index: 9, kind: input, shape index: {}]   ;;  %s2212_s10 = inlined_call_operand.vmem [shape: f32[1,128], index: 10, kind: input, shape index: {}]   ;;  %s2213_s11 = inlined_call_operand.hbm [shape: f32[2,16,128], index: 11, kind: output, shape index: {}]  }
   0x1   :  { %2221 = sst [smem:[#allocation19_spill]] %s2203_s1 }
   0x2   :  { %2222 = sst [smem:[#allocation20_spill]] %s2205_s3 }
   0x3   :  { %2223 = sst [smem:[#allocation21_spill]] %s2207_s5 }
   0x4   :  { %2224 = sst [smem:[#allocation22_spill]] %s2211_s9 }
   0x5   :  { %16 = vsyncpa [#allocation5], 0 }
   0x6   :  { %18 = vsyncpa [#allocation5 + $0x1], 0 }
   0x7   :  { %19 = vsyncpa [#allocation8], 0 }
   0x8   :  { %20 = vsyncpa [#allocation11], 0 }
   0x9   :  { %21 = vsyncpa [#allocation6], 0 }
   0xa   :  { %23 = vsyncpa [#allocation6 + $0x1], 0  ;;  %s1861_s17 = smov 0   ;;  %s1863_s18 = smov 0  }
   0xb   :  { %s1865_s19 = smov 0   ;;  %s1867_s20 = smov 0  }
   0xc LB: > { %s1882_s21 = sadd.s32 4294967295, %s1779_s20   ;;  %s1281_s22 = sadd.s32 4294967294, %s1779_s20   ;;  %s1779_s20 = sphi %s1867_s20, %s2252_s20   ;;  %s1775_s19 = sphi %s1865_s19, %s2251_s19   ;;  %s1771_s18 = sphi %s1863_s18, %s2250_s18   ;;  %s1767_s17 = sphi %s1861_s17, %s2249_s17  }
   0xd   : > { %p49_p0 = scmp.ne.s32.totalorder %s1771_s18, %s1767_s17  ;;  %p2215_p1 = scmp.eq.s32.totalorder %s1882_s21, 0 }
   0xe   : > { %p289_p3 = scmp.eq.s32.totalorder %s1281_s22, 1  ;;  %p1282_p5 = scmp.ge.s32.totalorder %s1779_s20, 1 }
   0xf   : > { %p1891_p4 = por %p2215_p1, %p49_p0  ;;  %p296_p7 = scmp.lt.s32.totalorder %s1779_s20, 3 }
  0x10   : > { %p1896_p6 = por %p289_p3, %p49_p0  ;;  %s1785_s26 = smov [#allocation7]  }
  0x11   : > { %s2225_s23 = scalar_select %p1891_p4, 1, 0 }
  0x12   : > { %s2226_s24 = scalar_select %p1896_p6, 1, 0 }
  0x13   : > { %p1901_p8 = pnand %p1282_p5, %p296_p7  ;;  %s308_s27 = sshll.u32 %s1785_s26, 4  ;;  %s309_s27 = int_to_ptr.vmem [resolvable:$true] %s308_s27 }
  0x14   : > { %2227 = sst [smem:[#allocation18_spill]] %s2226_s24  ;;  %s1786_s29 = smov [#allocation10]  }
  0x15   : > { %s2228_s25 = scalar_select %p1901_p8, 1, 0 }
  0x16   : > { %p1425_p9 = pneg %p1901_p8  ;;  %s340_s30 = sshll.u32 %s1786_s29, 4  ;;  %s341_s30 = int_to_ptr.vmem [resolvable:$true] %s340_s30 }
  0x17   : > { %s1582_s12 = scalar_lea.vmem %s309_s27, 1024  ;;  %p1590_p5 = scmp.lt.s32.totalorder %s309_s27, %s309_s27 }
  0x18   : > { %p1910_p11 = pnand %p1425_p9, %p2215_p1  ;;  %p1583_p13 = scmp.ne.s32.totalorder %s309_s27, %s1582_s12 }
  0x19   : > { %p1591_p7 = scmp.lt.s32.totalorder %s1582_s12, %s1582_s12 }
  0x1a   : > { %p1573_p12 = pneg %p1910_p11 }
  0x1b   : > { %p1592_p10 = por %p1591_p7, %p1590_p5 }
  0x1c   : > { %p1585_p0 = pnand %p1583_p13, %p1573_p12 }
  0x1e   : > { %p1586_p3 = pneg %p1585_p0 }
  0x20   : > { %p1593_p2 = pnand %p1592_p10, %p1586_p3 }
  0x22   : > { %1596 = shalt.err (!%p1593_p2)
}
  0x23   : > { %s2216_s13 = smov 64   ;;  %s2217_s14 = smov 4  }
  0x24   : > { %s2230_s1 = sld [smem:[#allocation19_spill]]  ;;  %s1789_s22 = smov [#allocation9]  }
  0x25   : > { %s324_s26 = sshll.u32 %s1789_s22, 4  ;;  %s1608_s29 = scalar_lea.vmem %s341_s30, 2048  ;;  %s325_s26 = int_to_ptr.vmem [resolvable:$true] %s324_s26 }
  0x26   : > { %p1609_p9 = scmp.ne.s32.totalorder %s341_s30, %s1608_s29  ;;  %p1616_p13 = scmp.lt.s32.totalorder %s341_s30, %s341_s30 }
  0x27   : > { %p1617_p0 = scmp.lt.s32.totalorder %s1608_s29, %s1608_s29 }
  0x28   : > { %p1611_p2 = pnand %p1609_p9, %p1573_p12 }
  0x29   : > { %p1618_p3 = por %p1617_p0, %p1616_p13 }
  0x2a   : > { %1428 = dma.hbm_to_vmem [thread:$0]  (!%p1910_p11), %s2230_s1, 1024, %s309_s27, [#allocation8], %s2216_s13, %s2216_s13, %s2217_s14  }
  0x2b   : > { %p1612_p10 = pneg %p1611_p2 }
  0x2d   : > { %p1619_p5 = pnand %p1618_p3, %p1612_p10 }
  0x2f   : > { %1622 = shalt.err (!%p1619_p5)
}
  0x30   : > { %s1790_s12 = smov 128   ;;  %s1791_s24 = smov 8  }
  0x31   : > { %s2231_s5 = sld [smem:[#allocation21_spill]]  ;;  %s1634_s16 = scalar_lea.vmem %s325_s26, 256 }
  0x32   : > { %p1635_p7 = scmp.ne.s32.totalorder %s325_s26, %s1634_s16  ;;  %p1642_p1 = scmp.lt.s32.totalorder %s325_s26, %s325_s26 }
  0x33   : > { %p1643_p13 = scmp.lt.s32.totalorder %s1634_s16, %s1634_s16 }
  0x34   : > { %p1637_p9 = pnand %p1635_p7, %p1573_p12 }
  0x35   : > { %p1644_p10 = por %p1643_p13, %p1642_p1 }
  0x36   : > { %p1638_p2 = pneg %p1637_p9 }
  0x37   : > { %1434 = dma.hbm_to_vmem [thread:$0]  (!%p1910_p11), %s2231_s5, 2048, %s341_s30, [#allocation11], %s1790_s12, %s1790_s12, %s1791_s24  }
  0x38   : > { %p1645_p0 = pnand %p1644_p10, %p1638_p2 }
  0x3a   : > { %1648 = shalt.err (!%p1645_p0)
}
  0x3b   : > { %s2232_s3 = sld [smem:[#allocation20_spill]]  ;;  %s1792_s30 = smov [#allocation12]  }
  0x3c   : > { %s362_s27 = sshll.u32 %s1792_s30, 4  ;;  %s363_s27 = int_to_ptr.vmem [resolvable:$true] %s362_s27 }
  0x3d   : > { %s1660_s15 = scalar_lea.vmem %s363_s27, 1024  ;;  %p1668_p9 = scmp.lt.s32.totalorder %s363_s27, %s363_s27 }
  0x3e   : > { %p1661_p3 = scmp.ne.s32.totalorder %s363_s27, %s1660_s15  ;;  %p1669_p1 = scmp.lt.s32.totalorder %s1660_s15, %s1660_s15 }
  0x40   : > { %p1663_p5 = pnand %p1661_p3, %p1573_p12  ;;  %p1670_p2 = por %p1669_p1, %p1668_p9 }
  0x41   : > { %1431 = dma.hbm_to_vmem [thread:$0]  (!%p1910_p11), %s2232_s3, 256, %s325_s26, [#allocation8], %s1790_s12, %s1790_s12, %s1791_s24  }
  0x42   : > { %p1664_p7 = pneg %p1663_p5 }
  0x44   : > { %p1671_p13 = pnand %p1670_p2, %p1664_p7 }
  0x46   : > { %1674 = shalt.err (!%p1671_p13)
}
  0x47   : > { %s2233_s9 = sld [smem:[#allocation22_spill]]  ;;  %s1955_s12 = sadd.s32 1, %s1779_s20  }
  0x48   : > { %s36_s28 = sadd.s32 1, %s1775_s19  ;;  %s33_s16 = ssub.s32 %s1779_s20, %s1955_s12 }
  0x49   : > { %p43_p12 = scmp.ne.s32.totalorder %s1775_s19, %s1771_s18  ;;  %p34_p10 = scmp.eq.s32.totalorder %s33_s16, 0 }
  0x4a   : > { %p44_p0 = scmp.eq.s32.totalorder %s1779_s20, 0  ;;  %p2234_p3 = scmp.eq.s32.totalorder %s1882_s21, 1 }
  0x4b   : > { %p1450_p7 = scmp.lt.s32.totalorder %s1779_s20, 2  ;;  %s379_s30 = sand.u32 1, %s1775_s19  }
  0x4c   : > { %p1965_p5 = por %p2234_p3, %p43_p12  ;;  %p45_p9 = por %p44_p0, %p43_p12 }
  0x4d   : > { %1437 = dma.hbm_to_vmem [thread:$0]  (!%p1910_p11), %s2233_s9, 1024, %s363_s27, [#allocation11], %s2216_s13, %s2216_s13, %s2217_s14  }
  0x4e   : > { %s2235_s22 = scalar_select %p1965_p5, 1, 0 }
  0x4f   : > { %s1971_s29 = scalar_select %p34_p10, %s1775_s19, %s36_s28  }
  0x50   : > { %s1288_s15 = sshll.u32 %s379_s30, 3  ;;  %s1343_s27 = sshll.u32 %s1779_s20, 7 }
  0x51   : > { %s1978_s13 = scalar_lea.hbm %s2202_s0, %s1343_s27  ;;  %s383_s16 = scalar_lea.vmem [#allocation4], %s1288_s15 }
  0x52   : > { %s390_s14 = sshll.u32 %s383_s16, 4  ;;  %p1982_p11 = pnand %p1450_p7, %p45_p9  ;;  %s1980_s14 = int_to_ptr.vmem [resolvable:$true] %s390_s14 }
  0x53   : > { %s1986_s28 = scalar_lea.sflag [#allocation5], %s379_s30  ;;  %s1675_s3 = scalar_lea.hbm %s1978_s13, 128 }
  0x54   : > { %p1676_p1 = scmp.ne.s32.totalorder %s1978_s13, %s1675_s3  ;;  %p1677_p2 = pneg %p1982_p11 }
  0x55   : > { %s1680_s15 = scalar_lea.hbm %s2202_s0, 256  ;;  %p1681_p10 = scmp.lt.s32.totalorder %s1978_s13, %s2202_s0 }
  0x56   : > { %p1678_p13 = pnand %p1677_p2, %p1676_p1  ;;  %p1682_p0 = scmp.lt.s32.totalorder %s1680_s15, %s1675_s3 }
  0x58   : > { %p1679_p12 = pneg %p1678_p13  ;;  %p1683_p3 = por %p1682_p0, %p1681_p10 }
  0x5a   : > { %p1684_p7 = pnand %p1683_p3, %p1679_p12 }
  0x5c   : > { %1687 = shalt.err (!%p1684_p7)
}
  0x5d   : > { %s1688_s30 = scalar_lea.vmem %s1980_s14, 128  ;;  %s1793_s5 = smov [#allocation4]  }
  0x5e   : > { %p1689_p9 = scmp.ne.s32.totalorder %s1980_s14, %s1688_s30  ;;  %s1693_s9 = sshll.u32 %s1793_s5, 4  ;;  %s1694_s9 = int_to_ptr.vmem [resolvable:$false] %s1693_s9 }
  0x5f   : > { %s1695_s27 = scalar_lea.vmem %s1694_s9, 256  ;;  %p1696_p13 = scmp.lt.s32.totalorder %s1980_s14, %s1694_s9 }
  0x60   : > { %p1691_p6 = pnand %p1689_p9, %p1677_p2  ;;  %p1697_p5 = scmp.lt.s32.totalorder %s1695_s27, %s1688_s30 }
  0x62   : > { %p1692_p1 = pneg %p1691_p6  ;;  %p1698_p4 = por %p1697_p5, %p1696_p13 }
  0x64   : > { %p1699_p8 = pnand %p1698_p4, %p1692_p1 }
  0x66   : > { %1702 = shalt.err (!%p1699_p8)
}
  0x67   : > { %s2237_s3 = smov 4   ;;  %s2238_s24 = smov 64  }
  0x68   : > { %1441 = dma.hbm_to_vmem [thread:$0]  (!%p1982_p11), %s1978_s13, 128, %s1980_s14, %s1986_s28, %s2238_s24, %s2238_s24, %s2237_s3  }
  0x69   : > { %p2239_p6 = scmp.ne.s32.totalorder %s2228_s25, 0 }
  0x6a   : > { %s2013_s5 = sand.u32 (!%p2239_p6), 1, %s1771_s18   ;;  %p2240_p4 = scmp.ne.s32.totalorder (!%p2239_p6), %s2225_s23, 0 }
  0x6b   : > { %402 = sbr.rel (%p2239_p6) target bundleno = 1071 (0x42f), region = 64  ;;  %s1292_s9 = sshll.u32 (!%p2239_p6), %s2013_s5, 3 }
  0x6c   : > { %s405_s15 = scalar_lea.sflag (!%p2239_p6), [#allocation5], %s2013_s5  ;;  %s2017_s26 = scalar_lea.vmem (!%p2239_p6), [#allocation4], %s1292_s9 }
  0x70   : > { %1750 = dma.done.wait (%p2240_p4), %s405_s15, 128  }
  0x71   : > { %1752 = vsyncadd (%p2240_p4), %s405_s15, 4294967168  ;;  %p2241_p8 = scmp.eq.s32.totalorder %s1882_s21, 0 }
  0x73   : > { %1754 = dma.done.wait (%p2241_p8), [#allocation8], 1280   ;;  %p2242_p5 = pmov %p2241_p8 }
  0x75   : > { %1756 = vsyncadd (%p2242_p5), [#allocation8], 4294966016  ;;  %p2243_p11 = pmov %p2242_p5 }
  0x76   : > { %p2244_p2 = pmov %p2242_p5 }
  0x77   : > { %1758 = dma.done.wait (%p2243_p11), [#allocation11], 3072  }
  0x78   : > { %1760 = vsyncadd (%p2244_p2), [#allocation11], 4294964224  ;;  %s1297_s1 = sshll.u32 %s2013_s5, 4  ;;  %v1794_v0 = vmov 0.0   ;;  %vm1795_vm0 = vmmov 0   ;;  %v1510_v1 = vld [vmem:[#allocation7 + $0x38] sm:$0xff]  }
  0x79   : > { %1365 = vmatprep.subr.bf16.mxu0 %v1794_v0  ;;  %584 = vst [vmem:[#allocation2] sm:$0xff] %v1794_v0  ;;  %585 = vst [vmem:[#allocation2 + $0x8] sm:$0xff] %v1794_v0  ;;  %1381 = vmatprep.mubr.msk.bf16.mxu0 %vm1795_vm0, %v1794_v0  ;;  %v1511_v2 = vld [vmem:[#allocation7 + $0x30] sm:$0xff]   ;;  %v1512_v3 = vld [vmem:[#allocation7 + $0x28] sm:$0xff]   ;;  %s2061_s28 = scalar_lea.vmem [#allocation13], %s1297_s1  ;;  %s2063_s16 = smov 0  }
  0x7a   : > { %1366 = vmatpush3.bf16.msra.mxu0 %v1510_v1  ;;  %v1513_v4 = vld [vmem:[#allocation7 + $0x20] sm:$0xff]   ;;  %v1514_v5 = vld [vmem:[#allocation7 + $0x18] sm:$0xff]   ;;  %v1515_v6 = vld [vmem:[#allocation7 + $0x10] sm:$0xff]  }
  0x7b   : > { %1367 = vmatprep.subr.bf16.mxu0 %v1794_v0  ;;  %v1516_v7 = vld [vmem:[#allocation7 + $0x8] sm:$0xff]   ;;  %v1517_v8 = vld [vmem:[#allocation7] sm:$0xff]   ;;  %v1518_v9 = vld [vmem:[%s2017_s26] sm:$0xff]  }
  0x7c   : > { %v1298_v10 = vld [vmem:[%s2204_s2] ss:$0 sm:$0xff] }
  0x7d   : > { %v1308_v12 = vld [vmem:[%s2206_s4] ss:$0 sm:$0xff] }
  0x7e   : > { %1368 = vmatpush3.bf16.msra.mxu0 %v1511_v2 }
  0x7f   : > { %1369 = vmatprep.subr.bf16.mxu0 %v1794_v0 }
  0x82   : > { %1370 = vmatpush3.bf16.msra.mxu0 %v1512_v3 }
  0x83   : > { %1371 = vmatprep.subr.bf16.mxu0 %v1794_v0 }
  0x86   : > { %1372 = vmatpush3.bf16.msra.mxu0 %v1513_v4 }
  0x87   : > { %1373 = vmatprep.subr.bf16.mxu0 %v1794_v0 }
  0x8a   : > { %1374 = vmatpush3.bf16.msra.mxu0 %v1514_v5 }
  0x8b   : > { %1375 = vmatprep.subr.bf16.mxu0 %v1794_v0 }
  0x8e   : > { %1376 = vmatpush3.bf16.msra.mxu0 %v1515_v6 }
  0x8f   : > { %1377 = vmatprep.subr.bf16.mxu0 %v1794_v0 }
  0x92   : > { %1378 = vmatpush3.bf16.msra.mxu0 %v1516_v7 }
  0x93   : > { %1379 = vmatprep.subr.bf16.mxu0 %v1794_v0 }
  0x96   : > { %1380 = vmatpush3.bf16.msra.mxu0 %v1517_v8 }
  0x99   : > { %1382 = vmatmul.mubr.bf16.vlgmr.msra.gmra.mxu0 %v1518_v9 }
 0x159   : > { %v577_v11 = vpop.f32.mrf.mxu0 }
 0x15a   : > { %v2051_v13 = vadd.f32 %v1298_v10, %v577_v11 }
 0x15b   : > { %v1383_v14 = vpop.f32.mrf.mxu0 }
 0x15c   : > { %586 = vst [vmem:[#allocation2 + $0x10] sm:$0xff] %v2051_v13  ;;  %v595_v15 = vmul.f32 %v1308_v12, %v2051_v13 }
 0x15d   : > { %v580_v16 = vpop.f32.mrf.mxu0 }
 0x15e   : > { %597 = vst [vmem:[#allocation3] sm:$0xff] %v595_v15  ;;  %v2055_v17 = vadd.f32 %v1298_v10, %v580_v16 }
 0x15f   : > { %v1384_v18 = vpop.f32.mrf.mxu0 }
 0x160   : > { %587 = vst [vmem:[#allocation2 + $0x18] sm:$0xff] %v2055_v17  ;;  %v596_v19 = vmul.f32 %v1308_v12, %v2055_v17 }
 0x162   : > { %598 = vst [vmem:[#allocation3 + $0x8] sm:$0xff] %v596_v19 }
 0x163 LB: >> { %v617_v20 = vlaneseq  ;;  %s1344_s30 = sshll.u32 %s1783_s16, 3  ;;  %vm635_vm1 = vcmask 1040384   ;;  %vm655_vm2 = vcmask 1041408   ;;  %vm675_vm3 = vcmask 1042432   ;;  %s604_s16 = sadd.s32 1, %s1783_s16   ;;  %s1783_s16 = sphi %s2063_s16, %s604_s16  }
 0x164   : >> { %s1345_s27 = sadd.s32 8, %s1344_s30  ;;  %s613_s24 = scalar_lea.vmem [#allocation9], %s1344_s30  ;;  %vm695_vm4 = vcmask 1043456   ;;  %vm715_vm5 = vcmask 1044480   ;;  %vm735_vm6 = vcmask 1045504   ;;  %vm755_vm7 = vcmask 1046528  }
 0x165   : >> { %v2069_v21 = vshrl.u32 %v617_v20, 7  ;;  %s607_s3 = ssub.s32 16, %s1345_s27  ;;  %v614_v22 = vld [vmem:[%s613_s24] sm:$0xff]  ;;  %p601_p12 = scmp.ge.s32.totalorder %s604_s16, 2  }
 0x166   : >> { %s2079_s9 = scalar_lea.vmem [#allocation2], %s607_s3  ;;  %v615_v37 = vld [vmem:[#allocation3] sm:$0xff]  ;;  %1385 = vmatprep.subr.bf16.mxu0 (%p601_p12), %v1794_v0  ;;  %1401 = vmatprep.mubr.msk.bf16.mxu0 (%p601_p12), %vm1795_vm0, %v1794_v0  ;;  %s1346_s30 = sshll.u32 (%p601_p12), %s1882_s21, 8 }
 0x167   : >> { %v619_v23 = vsub.s32 0, %v2069_v21  ;;  %v627_v24 = vsub.s32 1, %v2069_v21  ;;  %v647_v25 = vsub.s32 2, %v2069_v21  ;;  %v667_v26 = vsub.s32 3, %v2069_v21  ;;  %v609_v31 = vld [vmem:[%s2079_s9] sm:$0xff]  ;;  %v610_v32 = vld [vmem:[%s2079_s9 + $0x8] sm:$0xff] }
 0x168   : >> { %v687_v27 = vsub.s32 4, %v2069_v21  ;;  %v707_v28 = vsub.s32 5, %v2069_v21  ;;  %v727_v29 = vsub.s32 6, %v2069_v21  ;;  %v747_v30 = vsub.s32 7, %v2069_v21  ;;  %v611_v3 = vld [vmem:[%s2079_s9 + $0x10] sm:$0xff]  ;;  %v1544_v21 = vld [vmem:[#allocation12 + $0x30] sm:$0xff] (%p601_p12)   ;;  %s2156_s9 = scalar_lea.hbm (%p601_p12), %s2213_s11, %s1346_s30 }
 0x169   : >> { %v620_v33 = vrot.slane %v614_v22, %v619_v23  ;;  %v628_v34 = vrot.slane %v614_v22, %v627_v24  ;;  %v648_v35 = vrot.slane %v614_v22, %v647_v25  ;;  %v668_v36 = vrot.slane %v614_v22, %v667_v26  ;;  %v616_v11 = vld [vmem:[#allocation3 + $0x8] sm:$0xff]  ;;  %s1162_s27 = sshll.u32 (%p601_p12), %s2061_s28, 4  ;;  %s1149_s15 = scalar_lea.sflag (%p601_p12), [#allocation6], %s2013_s5  ;;  %s2158_s27 = int_to_ptr.vmem [resolvable:$true] %s1162_s27 }
 0x16a   : >> { %v688_v38 = vrot.slane %v614_v22, %v687_v27  ;;  %v708_v39 = vrot.slane %v614_v22, %v707_v28  ;;  %v728_v40 = vrot.slane %v614_v22, %v727_v29  ;;  %v2087_v41 = vrot.slane %v614_v22, %v747_v30  ;;  %s1703_s26 = scalar_lea.vmem (%p601_p12), %s2158_s27, 256  ;;  %p2245_p0 = scmp.ne.s32.totalorder (%p601_p12), %s2235_s22, 0 }
 0x16b   : >> { %v621_v42 = vmul.f32 %v620_v33, %v610_v32  ;;  %v629_v43 = vmul.f32 %v628_v34, %v609_v31  ;;  %v630_v44 = vmul.f32 %v628_v34, %v610_v32  ;;  %v649_v45 = vmul.f32 %v648_v35, %v609_v31  ;;  %p1704_p10 = scmp.ne.s32.totalorder (%p601_p12), %s2158_s27, %s1703_s26  ;;  %s1798_s21 = smov (%p601_p12), [#allocation13]  }
 0x16c   : >> { %v650_v46 = vmul.f32 %v648_v35, %v610_v32  ;;  %v669_v47 = vmul.f32 %v668_v36, %v609_v31  ;;  %v670_v48 = vmul.f32 %v668_v36, %v610_v32  ;;  %v689_v49 = vmul.f32 %v688_v38, %v609_v31  ;;  %s1707_s1 = sshll.u32 (%p601_p12), %s1798_s21, 4  ;;  %s1708_s1 = int_to_ptr.vmem [resolvable:$false] %s1707_s1 }
 0x16d   : >> { %v623_v50 = vadd.f32 %v621_v42, %v615_v37  ;;  %v636_v51 = vrot.slane %v629_v43, 7  ;;  %v637_v52 = vrot.slane %v630_v44, 7  ;;  %v656_v53 = vrot.slane %v649_v45, 6  ;;  %p1705_p3 = pnand (%p601_p12), %p1704_p10, %p2245_p0  ;;  %s1709_s23 = scalar_lea.vmem (%p601_p12), %s1708_s1, 512 }
 0x16e   : >> { %v657_v54 = vrot.slane %v650_v46, 6  ;;  %v676_v55 = vrot.slane %v669_v47, 5  ;;  %v677_v56 = vrot.slane %v670_v48, 5  ;;  %v690_v57 = vmul.f32 %v688_v38, %v610_v32  ;;  %p1710_p9 = scmp.lt.s32.totalorder (%p601_p12), %s2158_s27, %s1708_s1  ;;  %p1711_p1 = scmp.lt.s32.totalorder (%p601_p12), %s1709_s23, %s1703_s26 }
 0x16f   : >> { %v638_v58 = vsel %vm635_vm1, %v636_v51, %v637_v52  ;;  %v696_v59 = vrot.slane %v689_v49, 4  ;;  %v709_v60 = vmul.f32 %v708_v39, %v609_v31  ;;  %v710_v61 = vmul.f32 %v708_v39, %v610_v32  ;;  %p1706_p7 = pneg (%p601_p12), %p1705_p3 }
 0x170   : >> { %v643_v62 = vadd.f32 %v638_v58, %v623_v50  ;;  %v658_v63 = vsel %vm655_vm2, %v656_v53, %v657_v54  ;;  %v678_v1 = vsel %vm675_vm3, %v676_v55, %v677_v56  ;;  %v697_v2 = vrot.slane %v690_v57, 4  ;;  %p1712_p13 = por (%p601_p12), %p1711_p1, %p1710_p9 }
 0x171   : >> { %v716_v4 = vrot.slane %v709_v60, 3  ;;  %v717_v5 = vrot.slane %v710_v61, 3  ;;  %v729_v6 = vmul.f32 %v728_v40, %v609_v31  ;;  %v730_v7 = vmul.f32 %v728_v40, %v610_v32  ;;  %v1521_v61 = vld [vmem:[#allocation10 + $0x70] ss:$8 sps:$4 sm:$0xff] (%p601_p12)  }
 0x172   : >> { %v663_v8 = vadd.f32 %v658_v63, %v643_v62  ;;  %v749_v9 = vmul.f32 %v2087_v41, %v609_v31  ;;  %v750_v10 = vmul.f32 %v2087_v41, %v610_v32  ;;  %v698_v12 = vsel %vm695_vm4, %v696_v59, %v697_v2  ;;  %v1522_v63 = vld [vmem:[#allocation10 + $0x64] ss:$8 sps:$4 sm:$0xff] (%p601_p12)   ;;  %p1713_p6 = pnand (%p601_p12), %p1712_p13, %p1706_p7 }
 0x173   : >> { %v736_v14 = vrot.slane %v729_v6, 2  ;;  %v737_v15 = vrot.slane %v730_v7, 2  ;;  %v622_v16 = vmul.f32 %v620_v33, %v611_v3  ;;  %v718_v19 = vsel %vm715_vm5, %v716_v4, %v717_v5  ;;  %v1528_v4 = vld [vmem:[#allocation10 + $0x44] ss:$8 sps:$4 sm:$0xff] (%p601_p12)   ;;  %v1530_v6 = vld [vmem:[#allocation10 + $0x40] ss:$8 sps:$4 sm:$0xff] (%p601_p12)  }
 0x174   : >> { %v683_v18 = vadd.f32 %v678_v1, %v663_v8  ;;  %v756_v20 = vrot.slane %v749_v9, 1  ;;  %v631_v22 = vmul.f32 %v628_v34, %v611_v3  ;;  %v757_v25 = vrot.slane %v750_v10, 1  ;;  %v1524_v1 = vld [vmem:[#allocation10 + $0x60] ss:$8 sps:$4 sm:$0xff] (%p601_p12)   ;;  %v1531_v9 = vld [vmem:[#allocation10 + $0x34] ss:$8 sps:$4 sm:$0xff] (%p601_p12)  }
 0x175   : >> { %v624_v26 = vadd.f32 %v622_v16, %v616_v11  ;;  %v651_v27 = vmul.f32 %v648_v35, %v611_v3  ;;  %v671_v28 = vmul.f32 %v668_v36, %v611_v3  ;;  %v691_v31 = vmul.f32 %v688_v38, %v611_v3  ;;  %v1534_v16 = vld [vmem:[#allocation10 + $0x24] ss:$8 sps:$4 sm:$0xff] (%p601_p12)  }
 0x176   : >> { %v703_v29 = vadd.f32 %v698_v12, %v683_v18  ;;  %v639_v30 = vrot.slane %v631_v22, 7  ;;  %v738_v32 = vsel %vm735_vm6, %v736_v14, %v737_v15  ;;  %v711_v43 = vmul.f32 %v708_v39, %v611_v3  ;;  %v1533_v14 = vld [vmem:[#allocation10 + $0x30] ss:$8 sps:$4 sm:$0xff] (%p601_p12)   ;;  %v1536_v22 = vld [vmem:[#allocation10 + $0x20] ss:$8 sps:$4 sm:$0xff] (%p601_p12)  }
 0x177   : >> { %v659_v37 = vrot.slane %v651_v27, 6  ;;  %v679_v42 = vrot.slane %v671_v28, 5  ;;  %v699_v45 = vrot.slane %v691_v31, 4  ;;  %v731_v46 = vmul.f32 %v728_v40, %v611_v3  ;;  %v1540_v28 = vld [vmem:[#allocation10 + $0x4] ss:$8 sps:$4 sm:$0xff] (%p601_p12)  }
 0x178   : >> { %v723_v44 = vadd.f32 %v718_v19, %v703_v29  ;;  %v640_v33 = vsel %vm635_vm1, %v637_v52, %v639_v30  ;;  %v758_v34 = vsel %vm755_vm7, %v756_v20, %v757_v25  ;;  %v719_v49 = vrot.slane %v711_v43, 3  ;;  %v1542_v30 = vld [vmem:[#allocation10] ss:$8 sps:$4 sm:$0xff] (%p601_p12)  }
 0x179   : >> { %v644_v47 = vadd.f32 %v640_v33, %v624_v26  ;;  %v660_v35 = vsel %vm655_vm2, %v657_v54, %v659_v37  ;;  %v680_v48 = vsel %vm675_vm3, %v677_v56, %v679_v42  ;;  %v751_v38 = vmul.f32 %v2087_v41, %v611_v3  ;;  %v1519_v41 = vld [vmem:[#allocation10 + $0x74] ss:$8 sps:$4 sm:$0xff] (%p601_p12)   ;;  %v1527_v3 = vld [vmem:[#allocation10 + $0x50] ss:$8 sps:$4 sm:$0xff] (%p601_p12)  }
 0x17a   : >> { %v743_v36 = vadd.f32 %v738_v32, %v723_v44  ;;  %v700_v39 = vsel %vm695_vm4, %v697_v2, %v699_v45  ;;  %v739_v53 = vrot.slane %v731_v46, 2  ;;  %v720_v40 = vsel %vm715_vm5, %v717_v5, %v719_v49  ;;  %932 = vmatprep.subr.bf16.mxu1 (%p601_p12), %v1519_v41  ;;  %v1525_v2 = vld [vmem:[#allocation10 + $0x54] ss:$8 sps:$4 sm:$0xff] (%p601_p12)   ;;  %v1539_v26 = vld [vmem:[#allocation10 + $0x10] ss:$8 sps:$4 sm:$0xff] (%p601_p12)  }
 0x17b   : >> { %v664_v50 = vadd.f32 %v660_v35, %v644_v47  ;;  %v759_v52 = vrot.slane %v751_v38, 1  ;;  %v1796_v62 = vmov (%p601_p12), 0   ;;  %933 = vmatpush1.bf16.msra.mxu1 (%p601_p12), %v1521_v61 }
 0x17c   : >> { %v763_v51 = vadd.f32 %v758_v34, %v743_v36  ;;  %v740_v58 = vsel %vm735_vm6, %v737_v15, %v739_v53  ;;  %964 = vmatprep.mubr.bf16.mxu1 (%p601_p12), %v1796_v62  ;;  %934 = vmatprep.subr.bf16.mxu1 (%p601_p12), %v1522_v63 }
 0x17d   : >> { %v684_v55 = vadd.f32 %v680_v48, %v664_v50  ;;  %v760_v59 = vsel %vm755_vm7, %v757_v25, %v759_v52  ;;  %v1537_v25 = vld [vmem:[#allocation10 + $0x14] ss:$8 sps:$4 sm:$0xff] (%p601_p12)  }
 0x17e   : >> { %765 = vst [vmem:[#allocation3] sm:$0xff] %v763_v51 }
 0x17f   : >> { %v704_v57 = vadd.f32 %v700_v39, %v684_v55  ;;  %935 = vmatpush1.bf16.msra.mxu1 (%p601_p12), %v1524_v1 }
 0x180   : > { %936 = vmatprep.subr.bf16.mxu1 (%p601_p12), %v1525_v2 }
 0x181   : >> { %v724_v54 = vadd.f32 %v720_v40, %v704_v57 }
 0x183   : >> { %v744_v56 = vadd.f32 %v740_v58, %v724_v54  ;;  %603 = sbr.rel (!%p601_p12) target bundleno = 355 (0x163), region = 134  ;;  %937 = vmatpush1.bf16.msra.mxu1 (%p601_p12), %v1527_v3 }
 0x184   : > { %938 = vmatprep.subr.bf16.mxu1 (%p601_p12), %v1528_v4 }
 0x185   : >> { %v764_v60 = vadd.f32 %v760_v59, %v744_v56  ;;  %v2113_v5 = vld [vmem:[#allocation3] sm:$0xff] (%p601_p12)  ;;  %v1797_v56 = vmov (%p601_p12), -1.0  }
 0x186   : > { %v2118_v8 = vmul.f32 (%p601_p12), 0.70710677, %v2113_v5  ;;  %v769_v1 = vmul.f32 (%p601_p12), 0.5, %v2113_v5 }
 0x187   : >> { %766 = vst [vmem:[#allocation3 + $0x8] sm:$0xff] %v764_v60  ;;  %939 = vmatpush1.bf16.msra.mxu1 (%p601_p12), %v1530_v6 }
 0x188   : > { %v777_v11 = vand.u32 2147483647, %v2118_v8  ;;  %940 = vmatprep.subr.bf16.mxu1 %v1531_v9  ;;  %vm773_vm8 = vcmp.ge.f32.partialorder %v2118_v8, 0.0 }
 0x189   : > { %v775_v60 = vsel %vm773_vm8, 1.0, %v1797_v56 }
 0x18a   : > { %v779_v15 = vmul.f32 0.3275911, %v777_v11  ;;  %v805_v27 = vsub.f32 0.0, %v777_v11 }
 0x18b   : > { %941 = vmatpush1.bf16.msra.mxu1 %v1533_v14 }
 0x18c   : > { %v781_v19 = vadd.f32 1.0, %v779_v15  ;;  %942 = vmatprep.subr.bf16.mxu1 %v1534_v16  ;;  %v807_v31 = vmul.f32 %v805_v27, %v777_v11 }
 0x18e   : > { %v2115_v7 = vld [vmem:[#allocation3 + $0x8] sm:$0xff]  ;;  %1551 = vrcp.f32 %v781_v19  ;;  %v809_v37 = vmul.f32 1.442695, %v807_v31 }
 0x18f   : > { %v772_v10 = vmul.f32 0.70710677, %v2115_v7  ;;  %943 = vmatpush1.bf16.msra.mxu1 %v1536_v22  ;;  %v770_v3 = vmul.f32 0.5, %v2115_v7 }
 0x190   : > { %944 = vmatprep.subr.bf16.mxu1 %v1537_v25 }
 0x191   : > { %v778_v12 = vand.u32 2147483647, %v772_v10  ;;  %vm774_vm9 = vcmp.ge.f32.partialorder %v772_v10, 0.0  ;;  %v840_v10 = vld [vmem:[%s2208_s6] sm:$0x3] }
 0x192   : > { %v776_v61 = vsel %vm774_vm9, 1.0, %v1797_v56  ;;  %v849_v14 = vrot.slane %v840_v10, %v627_v24  ;;  %v845_v24 = vrot.slane %v840_v10, %v619_v23  ;;  %v1545_v23 = vld [vmem:[#allocation12 + $0x28] sm:$0xff]  }
 0x193   : > { %v780_v18 = vmul.f32 0.3275911, %v778_v12  ;;  %v806_v29 = vsub.f32 0.0, %v778_v12  ;;  %945 = vmatpush1.bf16.msra.mxu1 %v1539_v26 }
 0x194   : > { %946 = vmatprep.subr.bf16.mxu1 %v1540_v28 }
 0x195   : > { %v782_v20 = vadd.f32 1.0, %v780_v18  ;;  %v808_v32 = vmul.f32 %v806_v29, %v778_v12 }
 0x197   : > { %1553 = vrcp.f32 %v782_v20  ;;  %947 = vmatpush1.bf16.msra.mxu1 %v1542_v30  ;;  %v811_v43 = vmul.f32 1.442695, %v808_v32 }
 0x198   : > { %1555 = vpow2.f32 %v809_v37 }
 0x199   : > { %1557 = vpow2.f32 %v811_v43 }
 0x19b   : > { %v1552_v42 = vpop.eup %1551 }
 0x19c   : > { %v787_v33 = vmul.f32 1.0614054, %v1552_v42 }
 0x19e   : > { %v789_v46 = vadd.f32 -1.4531521, %v787_v33 }
 0x1a0   : > { %v791_v47 = vmul.f32 %v1552_v42, %v789_v46 }
 0x1a2   : > { %v793_v36 = vadd.f32 1.4214138, %v791_v47  ;;  %v1543_v47 = vld [vmem:[#allocation12 + $0x38] sm:$0xff]  }
 0x1a3   : > { %1386 = vmatpush3.bf16.msra.mxu0 %v1543_v47 }
 0x1a4   : > { %v1554_v44 = vpop.eup %1553  ;;  %v795_v49 = vmul.f32 %v1552_v42, %v793_v36  ;;  %1387 = vmatprep.subr.bf16.mxu0 %v1794_v0  ;;  %v1549_v36 = vld [vmem:[#allocation12 + $0x8] sm:$0xff]  }
 0x1a5   : > { %v788_v45 = vmul.f32 1.0614054, %v1554_v44  ;;  %v1556_v40 = vpop.eup %1555 }
 0x1a6   : > { %v797_v50 = vadd.f32 -0.28449672, %v795_v49  ;;  %v1558_v57 = vpop.eup %1557 }
 0x1a7   : > { %v790_v34 = vadd.f32 -1.4531521, %v788_v45  ;;  %1388 = vmatpush3.bf16.msra.mxu0 %v1544_v21 }
 0x1a8   : > { %v799_v39 = vmul.f32 %v1552_v42, %v797_v50  ;;  %1389 = vmatprep.subr.bf16.mxu0 %v1794_v0 }
 0x1a9   : > { %v792_v35 = vmul.f32 %v1554_v44, %v790_v34 }
 0x1aa   : > { %v801_v55 = vadd.f32 0.2548296, %v799_v39 }
 0x1ab   : > { %v794_v48 = vadd.f32 1.4214138, %v792_v35  ;;  %1390 = vmatpush3.bf16.msra.mxu0 %v1545_v23  ;;  %v1547_v35 = vld [vmem:[#allocation12 + $0x18] sm:$0xff]  }
 0x1ac   : > { %v803_v58 = vmul.f32 %v1552_v42, %v801_v55  ;;  %1391 = vmatprep.subr.bf16.mxu0 %v1794_v0 }
 0x1ad   : > { %v796_v38 = vmul.f32 %v1554_v44, %v794_v48  ;;  %v1550_v48 = vld [vmem:[#allocation12] sm:$0xff]  }
 0x1ae   : > { %v813_v59 = vmul.f32 %v1556_v40, %v803_v58 }
 0x1af   : > { %v798_v51 = vadd.f32 -0.28449672, %v796_v38 }
 0x1b0   : > { %v815_v62 = vsub.f32 1.0, %v813_v59 }
 0x1b1   : > { %v800_v53 = vmul.f32 %v1554_v44, %v798_v51 }
 0x1b2   : > { %v817_v2 = vmul.f32 %v815_v62, %v775_v60 }
 0x1b3   : > { %v802_v52 = vadd.f32 0.2548296, %v800_v53 }
 0x1b4   : > { %v819_v6 = vadd.f32 1.0, %v817_v2 }
 0x1b5   : > { %v804_v54 = vmul.f32 %v1554_v44, %v802_v52 }
 0x1b6   : > { %v821_v11 = vmul.f32 %v819_v6, %v769_v1 }
 0x1b7   : > { %v814_v41 = vmul.f32 %v1558_v57, %v804_v54 }
 0x1b9   : > { %v816_v63 = vsub.f32 1.0, %v814_v41 }
 0x1bb   : > { %v818_v4 = vmul.f32 %v816_v63, %v776_v61  ;;  %v1327_v61 = vld [vmem:[%s2209_s7] ss:$0 sm:$0xff] }
 0x1bd   : > { %v820_v9 = vadd.f32 1.0, %v818_v4 }
 0x1bf   : > { %v822_v8 = vmul.f32 %v820_v9, %v770_v3  ;;  %v1328_v3 = vld [vmem:[%s2210_s8] ss:$0 sm:$0xff] }
 0x1c1   : > { %v823_v12 = vpack.c.bf16 %v822_v8, %v821_v11  ;;  %v1329_v8 = vld [vmem:[%s2212_s10] ss:$0 sm:$0xff] }
 0x1c3   : > { %965 = vmatmul.mubr.bf16.vlgmr.msra.gmra.mxu1 %v823_v12 }
 0x283   : > { %v966_v15 = vpop.f32.mrf.mxu1 }
 0x284   : > { %v967_v31 = vadd.f32 %v966_v15, %v845_v24 }
 0x285   : > { %v968_v16 = vpop.f32.mrf.mxu1 }
 0x286   : > { %v969_v5 = vadd.f32 %v968_v16, %v849_v14 }
 0x287   : > { %v970_v18 = vpop.f32.mrf.mxu1 }
 0x288   : > { %v975_v19 = vsub.f32 0.0, %v969_v5  ;;  %v971_v42 = vadd.f32 %v970_v18, %v845_v24 }
 0x289   : > { %v972_v7 = vpop.f32.mrf.mxu1 }
 0x28a   : > { %v977_v20 = vmul.f32 1.442695, %v975_v19  ;;  %v973_v22 = vadd.f32 %v972_v7, %v849_v14 }
 0x28c   : > { %1559 = vpow2.f32 %v977_v20  ;;  %v976_v25 = vsub.f32 0.0, %v973_v22 }
 0x28e   : > { %v979_v26 = vmul.f32 1.442695, %v976_v25 }
 0x290   : > { %1561 = vpow2.f32 %v979_v26 }
 0x299   : > { %v1560_v27 = vpop.eup %1559 }
 0x29a   : > { %v981_v28 = vadd.f32 1.0, %v1560_v27 }
 0x29c   : > { %1563 = vrcp.f32 %v981_v28 }
 0x29d   : > { %v1562_v29 = vpop.eup %1561 }
 0x29e   : > { %v982_v30 = vadd.f32 1.0, %v1562_v29 }
 0x2a0   : > { %1565 = vrcp.f32 %v982_v30 }
 0x2a9   : > { %v1564_v32 = vpop.eup %1563 }
 0x2aa   : > { %v985_v37 = vmul.f32 %v1564_v32, %v967_v31 }
 0x2ac   : > { %v987_v43 = vadd.f32 %v985_v37, %v2051_v13  ;;  %v1546_v13 = vld [vmem:[#allocation12 + $0x20] sm:$0xff]  }
 0x2ad   : > { %v1566_v44 = vpop.eup %1565  ;;  %1392 = vmatpush3.bf16.msra.mxu0 %v1546_v13 }
 0x2ae   : > { %989 = vadd.xlane.f32.xlu0 %v987_v43  ;;  %v995_v33 = vmul.f32 %v987_v43, %v987_v43  ;;  %v986_v45 = vmul.f32 %v1566_v44, %v971_v42  ;;  %1393 = vmatprep.subr.bf16.mxu0 %v1794_v0 }
 0x2b0   : > { %997 = vadd.xlane.f32.xlu1 %v995_v33  ;;  %v988_v46 = vadd.f32 %v986_v45, %v2055_v17  ;;  %v1548_v17 = vld [vmem:[#allocation12 + $0x10] sm:$0xff]  }
 0x2b1   : > { %1394 = vmatpush3.bf16.msra.mxu0 %v1547_v35 }
 0x2b2   : > { %991 = vadd.xlane.f32.xlu0 %v988_v46  ;;  %v996_v34 = vmul.f32 %v988_v46, %v988_v46  ;;  %1395 = vmatprep.subr.bf16.mxu0 %v1794_v0 }
 0x2b4   : > { %999 = vadd.xlane.f32.xlu1 %v996_v34 }
 0x2b5   : > { %1396 = vmatpush3.bf16.msra.mxu0 %v1548_v17 }
 0x2b6   : > { %1397 = vmatprep.subr.bf16.mxu0 %v1794_v0 }
 0x2b9   : > { %1398 = vmatpush3.bf16.msra.mxu0 %v1549_v36 }
 0x2ba   : > { %1399 = vmatprep.subr.bf16.mxu0 %v1794_v0 }
 0x2bd   : > { %1400 = vmatpush3.bf16.msra.mxu0 %v1550_v48 }
 0x337   : > { %v990_v49 = vpop.xlane.xlu0 %989 }
 0x338   : > { %v993_v38 = vmul.f32 0.03125, %v990_v49 }
 0x339   : > { %v998_v50 = vpop.xlane.xlu1 %997 }
 0x33a   : > { %v1003_v51 = vmul.f32 %v993_v38, %v993_v38  ;;  %v1001_v39 = vmul.f32 0.03125, %v998_v50  ;;  %v1007_v60 = vsub.f32 %v987_v43, %v993_v38 }
 0x33b   : > { %v992_v53 = vpop.xlane.xlu0 %991 }
 0x33c   : > { %v1005_v55 = vsub.f32 %v1001_v39, %v1003_v51  ;;  %v994_v40 = vmul.f32 0.03125, %v992_v53 }
 0x33d   : > { %v1000_v52 = vpop.xlane.xlu1 %999 }
 0x33e   : > { %v1009_v57 = vadd.f32 1e-05, %v1005_v55  ;;  %v1004_v58 = vmul.f32 %v994_v40, %v994_v40  ;;  %v1002_v54 = vmul.f32 0.03125, %v1000_v52  ;;  %v1008_v62 = vsub.f32 %v988_v46, %v994_v40 }
 0x340   : > { %1567 = vrsqrt.f32 %v1009_v57  ;;  %v1006_v59 = vsub.f32 %v1002_v54, %v1004_v58 }
 0x342   : > { %v1010_v56 = vadd.f32 1e-05, %v1006_v59 }
 0x344   : > { %1569 = vrsqrt.f32 %v1010_v56 }
 0x34d   : > { %v1568_v41 = vpop.eup %1567 }
 0x34e   : > { %v1013_v0 = vmul.f32 %v1568_v41, %v1007_v60 }
 0x350   : > { %v1022_v2 = vmul.f32 %v1327_v61, %v1013_v0 }
 0x351   : > { %v1570_v63 = vpop.eup %1569 }
 0x352   : > { %v1014_v1 = vmul.f32 %v1570_v63, %v1008_v62  ;;  %v1031_v6 = vadd.f32 %v1328_v3, %v1022_v2 }
 0x354   : > { %v1023_v4 = vmul.f32 %v1327_v61, %v1014_v1 }
 0x356   : > { %v1032_v9 = vadd.f32 %v1328_v3, %v1023_v4 }
 0x358   : > { %v1033_v11 = vpack.c.bf16 %v1032_v9, %v1031_v6 }
 0x35a   : > { %1402 = vmatmul.mubr.bf16.vlgmr.msra.gmra.mxu0 %v1033_v11 }
 0x41a   : > { %v1139_v12 = vpop.f32.mrf.mxu0 }
 0x41b   : > { %v1140_v10 = vadd.f32 %v1329_v8, %v1139_v12 }
 0x41c   : > { %v1403_v14 = vpop.f32.mrf.mxu0 }
 0x41d   : > { %1146 = vst [vmem:[%s2061_s28] sm:$0xff] %v1140_v10 }
 0x41e   : > { %v1142_v15 = vpop.f32.mrf.mxu0 }
 0x41f   : > { %v1143_v16 = vadd.f32 %v1329_v8, %v1142_v15 }
 0x420   : > { %v1404_v5 = vpop.f32.mrf.mxu0 }
 0x421   : > { %1147 = vst [vmem:[%s2061_s28 + $0x8] sm:$0xff] %v1143_v16 }
 0x422   : > { %1716 = shalt.err (!%p1713_p6)
}
 0x423   : > { %s1717_s28 = scalar_lea.hbm %s2156_s9, 256  ;;  %s1721_s14 = scalar_lea.hbm %s2213_s11, 512 }
 0x424   : > { %p1718_p4 = scmp.ne.s32.totalorder %s2156_s9, %s1717_s28  ;;  %p1722_p11 = scmp.lt.s32.totalorder %s2156_s9, %s2213_s11 }
 0x425   : > { %p1723_p2 = scmp.lt.s32.totalorder %s1721_s14, %s1717_s28 }
 0x426   : > { %p1719_p8 = pnand %p1718_p4, %p2245_p0 }
 0x427   : > { %p1724_p12 = por %p1723_p2, %p1722_p11 }
 0x428   : > { %p1720_p5 = pneg %p1719_p8 }
 0x42a   : > { %p1725_p10 = pnand %p1724_p12, %p1720_p5 }
 0x42c   : > { %1728 = shalt.err (!%p1725_p10)
}
 0x42d   : > { %s1799_s3 = smov 128   ;;  %s1800_s24 = smov 8  }
 0x42e   : > { %1423 = dma.vmem_to_hbm [thread:$0]  (%p2245_p0), %s2158_s27, 256, %s2156_s9, %s1149_s15, %s1799_s3, %s1799_s3, %s1800_s24  }
 0x42f PF: > { %s2246_s26 = sld [smem:[#allocation18_spill]]  ;;  %s1177_s21 = sand.u32 1, %s1767_s17  }
 0x430   : > { %p2248_p7 = scmp.ge.s32.totalorder %s1779_s20, 2  ;;  %s1178_s1 = scalar_lea.sflag [#allocation6], %s1177_s21 }
 0x435   : > { %p2247_p3 = scmp.ne.s32.totalorder %s2246_s26, 0 }
 0x437   : > { %p1443_p9 = pnand %p2248_p7, %p2247_p3 }
 0x439   : > { %p1444_p1 = pneg %p1443_p9 }
 0x43b   : > { %1762 = dma.done.wait (%p1444_p1), %s1178_s1, 256  }
 0x43c   : > { %1764 = vsyncadd (%p1444_p1), %s1178_s1, 4294967040  ;;  %p26_p13 = scmp.ge.s32.totalorder %s1955_s12, 4   ;;  %s2249_s17 = smov %s1771_s18 }
 0x43d   : > { %s2250_s18 = smov %s1775_s19  ;;  %s2251_s19 = smov %s1971_s29 }
 0x43e   : > { %s2252_s20 = smov %s1955_s12  ;;  %28 = sbr.rel (!%p26_p13) target bundleno = 12 (0xc), region = 145 }
 0x443   :  { %1183 = vsyncpa [#allocation5], 1 }
 0x444   :  { %1185 = vsyncpa [#allocation5 + $0x1], 1 }
 0x445   :  { %1186 = vsyncpa [#allocation8], 1 }
 0x446   :  { %1187 = vsyncpa [#allocation11], 1 }
 0x447   :  { %1188 = vsyncpa [#allocation6], 1 }
 0x448   :  { %1190 = vsyncpa [#allocation6 + $0x1], 1 }

</bundles_post_ra>
